<compile_context>
chip_gen: v7x
topology: tpu7x:2x2x1
jax: 0.10.0
libtpu: 0.0.40
codegen_flags: <defaults>
</compile_context>

<pallas_src>
import functools

import jax
import jax.numpy as jnp
from jax.experimental import pallas as pl
from jax.experimental.pallas import tpu as pltpu


def _round_up(x, m):
    return ((x + m - 1) // m) * m


def _mlp_kernel(desc_ref, w_ref, b_ref, out_ref, *, num_hidden, d_pad):
    """Fused MLP on one batch tile, batch-on-lanes.

    desc_ref: (d_pad, TILE_B)  compute dtype; desc^T (features on sublanes)
    w_ref   : (L, PAD, PAD)    compute dtype; layer l holds W_l^T at [:out_l, :in_l]
    b_ref   : (L, PAD, 1)      float32 biases (zero-padded)
    out_ref : (1, TILE_B)      float32, lane-dense row of final outputs
    """
    x = desc_ref[...]                                        # (d_pad, TILE_B)

    # Layer 0: contract over the natural feature width d_pad (static lane slice
    # of the resident weight slab -> desc HBM bytes stay at width d_pad).
    w0 = w_ref[0, :, 0:d_pad]                                # (PAD, d_pad)
    y = jnp.dot(w0, x, preferred_element_type=jnp.float32)   # (PAD, TILE_B), f32 acc
    y = y + b_ref[0]                                         # (PAD, 1) bias across lanes
    x = jnp.maximum(y, 0.0).astype(w0.dtype)                 # ReLU in f32, cast for MXU

    # Hidden layers 1..num_hidden-1: (PAD, PAD) x (PAD, TILE_B); padded rows stay 0.
    for l in range(1, num_hidden):                           # static unrolled loop
        y = jnp.dot(w_ref[l], x, preferred_element_type=jnp.float32)
        y = y + b_ref[l]
        x = jnp.maximum(y, 0.0).astype(w0.dtype)

    # Final layer (hidden -> 1): (1, PAD) x (PAD, TILE_B) -> (1, TILE_B), lane-dense.
    y = jnp.dot(w_ref[num_hidden, 0:1, :], x, preferred_element_type=jnp.float32)
    y = jnp.maximum(y + b_ref[num_hidden, 0:1, :], 0.0)      # bias + ReLU (matches reference)
    out_ref[...] = y.astype(out_ref.dtype)


def pack_params(params, desc_dim, compute_dtype):
    """Pack [(W(in,out), b(out,))] into a transposed, lane-padded weight slab + bias slab."""
    assert params[-1][0].shape[1] == 1, "last layer must have out_dim == 1"
    dims = [desc_dim] + [w.shape[1] for w, _ in params]
    pad = _round_up(max(max(dims), 128), 128)   # lane dim padded to a multiple of 128
    d_pad = _round_up(desc_dim, 8)              # desc feature width kept natural (sublane-aligned)
    n = len(params)
    w_slab = jnp.zeros((n, pad, pad), jnp.float32)
    b_slab = jnp.zeros((n, pad, 1), jnp.float32)
    for l, (w, b) in enumerate(params):
        fi, fo = w.shape
        w_slab = w_slab.at[l, :fo, :fi].set(w.T)           # store W^T
        b_slab = b_slab.at[l, :fo, 0].set(b.reshape(-1))
    return w_slab.astype(compute_dtype), b_slab, pad, d_pad


def fully_connected_second(structure, desc, params, *,
                           compute_dtype=jnp.bfloat16, tile_b_max=8192):
    """params: list of (W, b) with W shaped (in, out), b shaped (out,)."""
    del structure  # unused by the reference forward()
    batch, d = desc.shape
    num_layers = len(params)
    w_slab, b_slab, pad, d_pad = pack_params(params, d, compute_dtype)

    # Batch tiling: tiles are multiples of 128 (unmasked lane-dense stores), capped
    # at tile_b_max, and we use >=2 tiles whenever possible so the "parallel" batch
    # axis shards across v7x's two TensorCores.
    MIN_TILE = 128
    pb0 = _round_up(batch, MIN_TILE)
    max_tiles = pb0 // MIN_TILE
    grid_b = min(max_tiles, max(2, pl.cdiv(pb0, tile_b_max)))
    tile_b = _round_up(pl.cdiv(pb0, grid_b), MIN_TILE)
    padded_batch = tile_b * grid_b

    # desc^T: features on sublanes, batch on lanes (layout plumbing in the wrapper,
    # keeps all transposes out of the kernel).
    desc_t = jnp.pad(desc, ((0, padded_batch - batch), (0, d_pad - d))).T.astype(compute_dtype)

    flops = 2 * padded_batch * sum(w.shape[0] * w.shape[1] for w, _ in params)
    bytes_accessed = (desc_t.size * desc_t.dtype.itemsize
                      + w_slab.size * w_slab.dtype.itemsize
                      + b_slab.size * b_slab.dtype.itemsize
                      + padded_batch * 4)

    kernel = pl.pallas_call(
        functools.partial(_mlp_kernel, num_hidden=num_layers - 1, d_pad=d_pad),
        out_shape=jax.ShapeDtypeStruct((1, padded_batch), jnp.float32),
        grid=(grid_b,),
        in_specs=[
            pl.BlockSpec((d_pad, tile_b), lambda i: (0, i)),               # desc^T tile (pipelined)
            pl.BlockSpec((num_layers, pad, pad), lambda i: (0, 0, 0)),     # weight slab (resident)
            pl.BlockSpec((num_layers, pad, 1), lambda i: (0, 0, 0)),       # bias slab (resident)
        ],
        out_specs=pl.BlockSpec((1, tile_b), lambda i: (0, i)),             # lane-dense row
        compiler_params=pltpu.CompilerParams(dimension_semantics=("parallel",)),
        cost_estimate=pl.CostEstimate(flops=flops, transcendentals=0,
                                      bytes_accessed=bytes_accessed),
    )
    out_row = kernel(desc_t, w_slab, b_slab)                 # (1, padded_batch) f32
    return out_row[0, :batch].reshape(batch, 1)


# ----------------------------- setup / reference -----------------------------

def _init_linear(key, fan_in, fan_out):
    """PyTorch nn.Linear default init: U(-1/sqrt(fan_in), 1/sqrt(fan_in))."""
    kw, kb = jax.random.split(key)
    bound = 1.0 / (fan_in ** 0.5)
    w = jax.random.uniform(kw, (fan_in, fan_out), jnp.float32, -bound, bound)
    b = jax.random.uniform(kb, (fan_out,), jnp.float32, -bound, bound)
    return w, b


def make_params(key, desc_dim, fc_last=50, fc_second_size=(32, 32, 32)):
    sizes = [desc_dim, fc_last] + list(fc_second_size) + [1]
    params = []
    for i in range(len(sizes) - 1):
        key, sub = jax.random.split(key)
        params.append(_init_linear(sub, sizes[i], sizes[i + 1]))
    return params


def _reference(desc, params, compute_dtype=jnp.float32):
    """Pure-JAX reference mirroring kernel numerics: MXU operands in compute_dtype,
    f32 accumulation, f32 bias-add + ReLU.  (W^T @ x^T)^T == x @ W exactly."""
    x = desc
    for w, b in params:
        y = jnp.dot(x.astype(compute_dtype), w.astype(compute_dtype),
                    preferred_element_type=jnp.float32)
        x = jnp.maximum(y + b, 0.0)
    return x


if __name__ == "__main__":
    key = jax.random.PRNGKey(0)
    k_desc, k_struct, k_params, k_desc2 = jax.random.split(key, 4)

    # Small shapes consistent with the module: desc_dim=64 -> (64->50->32->32->32->1)
    batch, desc_dim = 8, 64
    desc = jax.random.normal(k_desc, (batch, desc_dim), jnp.float32)
    structure = jax.random.normal(k_struct, (batch, 16), jnp.float32)  # unused by forward()
    params = make_params(k_params, desc_dim)

    # 1) exact-math f32 path
    out_f32 = jax.block_until_ready(
        fully_connected_second(structure, desc, params, compute_dtype=jnp.float32))
    ref_f32 = _reference(desc, params, jnp.float32)
    assert out_f32.shape == (batch, 1), out_f32.shape
    assert jnp.allclose(out_f32, ref_f32, atol=1e-5, rtol=1e-5), "f32 mismatch vs reference"

    # 2) default bf16-MXU fast path, checked against a bf16-emulating reference
    out_bf16 = jax.block_until_ready(fully_connected_second(structure, desc, params))
    ref_bf16 = _reference(desc, params, jnp.bfloat16)
    assert jnp.allclose(out_bf16, ref_bf16, atol=1e-4, rtol=1e-4), "bf16 mismatch vs reference"

    # 3) multi-tile / ragged-batch path (grid > 1, batch padding) at a still-small shape
    batch2 = 600
    desc2 = jax.random.normal(k_desc2, (batch2, desc_dim), jnp.float32)
    out2 = jax.block_until_ready(
        fully_connected_second(None, desc2, params, compute_dtype=jnp.float32, tile_b_max=256))
    ref2 = _reference(desc2, params, jnp.float32)
    assert out2.shape == (batch2, 1), out2.shape
    assert jnp.allclose(out2, ref2, atol=1e-5, rtol=1e-5), "tiled-path mismatch vs reference"

    print("KERNEL_OK")
</pallas_src>

<mosaic_0001>
module attributes {stable_mosaic.version = 11 : i64} {
  func.func @_mlp_kernel(%arg0: i32, %arg1: memref<64x128xf32, #tpu.memory_space<vmem>>, %arg2: memref<5x128x128xf32, #tpu.memory_space<vmem>>, %arg3: memref<5x128x1xf32, #tpu.memory_space<vmem>>, %arg4: memref<1x128xf32, #tpu.memory_space<vmem>>) attributes {dimension_semantics = [#tpu.dimension_semantics<parallel>], iteration_bounds = array<i64: 1>, scalar_prefetch = 0 : i64, scratch_operands = 0 : i64, tpu.core_type = #tpu.core_type<tc>, window_params = [{transform_indices = @transform_0, window_bounds = array<i64: 64, 128>}, {pipeline_mode = #tpu.pipeline_mode<synchronous>, transform_indices = @transform_1, window_bounds = array<i64: 5, 128, 128>}, {pipeline_mode = #tpu.pipeline_mode<synchronous>, transform_indices = @transform_2, window_bounds = array<i64: 5, 128, 1>}, {transform_indices = @transform_3, window_bounds = array<i64: 1, 128>}]} {
    %c0 = arith.constant 0 : index
    %c0_0 = arith.constant 0 : index
    %0 = vector.load %arg1[%c0, %c0_0] : memref<64x128xf32, #tpu.memory_space<vmem>>, vector<64x128xf32>
    %c0_1 = arith.constant 0 : index
    %c0_2 = arith.constant 0 : index
    %c0_3 = arith.constant 0 : index
    %1 = vector.load %arg2[%c0_1, %c0_2, %c0_3] : memref<5x128x128xf32, #tpu.memory_space<vmem>>, vector<1x128x64xf32>
    %2 = vector.shape_cast %1 : vector<1x128x64xf32> to vector<128x64xf32>
    %cst = arith.constant dense<0.000000e+00> : vector<128x128xf32>
    %3 = tpu.matmul %2, %0, %cst {dimension_numbers = #tpu.dot_dimension_numbers<[1], [0], [0], [1], [0, 0, 1, 1], [], []>} : vector<128x64xf32>, vector<64x128xf32>, vector<128x128xf32> -> vector<128x128xf32>
    %c0_4 = arith.constant 0 : index
    %c0_5 = arith.constant 0 : index
    %c0_6 = arith.constant 0 : index
    %4 = vector.load %arg3[%c0_4, %c0_5, %c0_6] : memref<5x128x1xf32, #tpu.memory_space<vmem>>, vector<1x128x1xf32>
    %5 = vector.shape_cast %4 : vector<1x128x1xf32> to vector<128x1xf32>
    %6 = vector.broadcast %5 : vector<128x1xf32> to vector<128x128xf32>
    %7 = arith.addf %3, %6 : vector<128x128xf32>
    %cst_7 = arith.constant 0.000000e+00 : f32
    %8 = vector.broadcast %cst_7 : f32 to vector<128x128xf32>
    %9 = arith.maximumf %7, %8 : vector<128x128xf32>
    %c1 = arith.constant 1 : index
    %c0_8 = arith.constant 0 : index
    %c0_9 = arith.constant 0 : index
    %10 = vector.load %arg2[%c1, %c0_8, %c0_9] : memref<5x128x128xf32, #tpu.memory_space<vmem>>, vector<1x128x128xf32>
    %11 = vector.shape_cast %10 : vector<1x128x128xf32> to vector<128x128xf32>
    %cst_10 = arith.constant dense<0.000000e+00> : vector<128x128xf32>
    %12 = tpu.matmul %11, %9, %cst_10 {dimension_numbers = #tpu.dot_dimension_numbers<[1], [0], [0], [1], [0, 0, 1, 1], [], []>} : vector<128x128xf32>, vector<128x128xf32>, vector<128x128xf32> -> vector<128x128xf32>
    %c1_11 = arith.constant 1 : index
    %c0_12 = arith.constant 0 : index
    %c0_13 = arith.constant 0 : index
    %13 = vector.load %arg3[%c1_11, %c0_12, %c0_13] : memref<5x128x1xf32, #tpu.memory_space<vmem>>, vector<1x128x1xf32>
    %14 = vector.shape_cast %13 : vector<1x128x1xf32> to vector<128x1xf32>
    %15 = vector.broadcast %14 : vector<128x1xf32> to vector<128x128xf32>
    %16 = arith.addf %12, %15 : vector<128x128xf32>
    %cst_14 = arith.constant 0.000000e+00 : f32
    %17 = vector.broadcast %cst_14 : f32 to vector<128x128xf32>
    %18 = arith.maximumf %16, %17 : vector<128x128xf32>
    %c2 = arith.constant 2 : index
    %c0_15 = arith.constant 0 : index
    %c0_16 = arith.constant 0 : index
    %19 = vector.load %arg2[%c2, %c0_15, %c0_16] : memref<5x128x128xf32, #tpu.memory_space<vmem>>, vector<1x128x128xf32>
    %20 = vector.shape_cast %19 : vector<1x128x128xf32> to vector<128x128xf32>
    %cst_17 = arith.constant dense<0.000000e+00> : vector<128x128xf32>
    %21 = tpu.matmul %20, %18, %cst_17 {dimension_numbers = #tpu.dot_dimension_numbers<[1], [0], [0], [1], [0, 0, 1, 1], [], []>} : vector<128x128xf32>, vector<128x128xf32>, vector<128x128xf32> -> vector<128x128xf32>
    %c2_18 = arith.constant 2 : index
    %c0_19 = arith.constant 0 : index
    %c0_20 = arith.constant 0 : index
    %22 = vector.load %arg3[%c2_18, %c0_19, %c0_20] : memref<5x128x1xf32, #tpu.memory_space<vmem>>, vector<1x128x1xf32>
    %23 = vector.shape_cast %22 : vector<1x128x1xf32> to vector<128x1xf32>
    %24 = vector.broadcast %23 : vector<128x1xf32> to vector<128x128xf32>
    %25 = arith.addf %21, %24 : vector<128x128xf32>
    %cst_21 = arith.constant 0.000000e+00 : f32
    %26 = vector.broadcast %cst_21 : f32 to vector<128x128xf32>
    %27 = arith.maximumf %25, %26 : vector<128x128xf32>
    %c3 = arith.constant 3 : index
    %c0_22 = arith.constant 0 : index
    %c0_23 = arith.constant 0 : index
    %28 = vector.load %arg2[%c3, %c0_22, %c0_23] : memref<5x128x128xf32, #tpu.memory_space<vmem>>, vector<1x128x128xf32>
    %29 = vector.shape_cast %28 : vector<1x128x128xf32> to vector<128x128xf32>
    %cst_24 = arith.constant dense<0.000000e+00> : vector<128x128xf32>
    %30 = tpu.matmul %29, %27, %cst_24 {dimension_numbers = #tpu.dot_dimension_numbers<[1], [0], [0], [1], [0, 0, 1, 1], [], []>} : vector<128x128xf32>, vector<128x128xf32>, vector<128x128xf32> -> vector<128x128xf32>
    %c3_25 = arith.constant 3 : index
    %c0_26 = arith.constant 0 : index
    %c0_27 = arith.constant 0 : index
    %31 = vector.load %arg3[%c3_25, %c0_26, %c0_27] : memref<5x128x1xf32, #tpu.memory_space<vmem>>, vector<1x128x1xf32>
    %32 = vector.shape_cast %31 : vector<1x128x1xf32> to vector<128x1xf32>
    %33 = vector.broadcast %32 : vector<128x1xf32> to vector<128x128xf32>
    %34 = arith.addf %30, %33 : vector<128x128xf32>
    %cst_28 = arith.constant 0.000000e+00 : f32
    %35 = vector.broadcast %cst_28 : f32 to vector<128x128xf32>
    %36 = arith.maximumf %34, %35 : vector<128x128xf32>
    %c4 = arith.constant 4 : index
    %c0_29 = arith.constant 0 : index
    %c0_30 = arith.constant 0 : index
    %37 = vector.load %arg2[%c4, %c0_29, %c0_30] : memref<5x128x128xf32, #tpu.memory_space<vmem>>, vector<1x1x128xf32>
    %38 = vector.shape_cast %37 : vector<1x1x128xf32> to vector<1x128xf32>
    %cst_31 = arith.constant dense<0.000000e+00> : vector<1x128xf32>
    %39 = tpu.matmul %38, %36, %cst_31 {dimension_numbers = #tpu.dot_dimension_numbers<[1], [0], [0], [1], [0, 0, 1, 1], [], []>} : vector<1x128xf32>, vector<128x128xf32>, vector<1x128xf32> -> vector<1x128xf32>
    %c4_32 = arith.constant 4 : index
    %c0_33 = arith.constant 0 : index
    %c0_34 = arith.constant 0 : index
    %40 = vector.load %arg3[%c4_32, %c0_33, %c0_34] : memref<5x128x1xf32, #tpu.memory_space<vmem>>, vector<1x1x1xf32>
    %41 = vector.shape_cast %40 : vector<1x1x1xf32> to vector<1x1xf32>
    %42 = vector.broadcast %41 : vector<1x1xf32> to vector<1x128xf32>
    %43 = arith.addf %39, %42 : vector<1x128xf32>
    %cst_35 = arith.constant 0.000000e+00 : f32
    %44 = vector.broadcast %cst_35 : f32 to vector<1x128xf32>
    %45 = arith.maximumf %43, %44 : vector<1x128xf32>
    %c0_36 = arith.constant 0 : index
    %c0_37 = arith.constant 0 : index
    %46 = vector.load %arg4[%c0_36, %c0_37] : memref<1x128xf32, #tpu.memory_space<vmem>>, vector<1x128xf32>
    tpu.vector_store %arg4[%c0_36, %c0_37], %45 {strides = array<i32>} : memref<1x128xf32, #tpu.memory_space<vmem>>, vector<1x128xf32>,
    return
  }
  func.func @transform_0(%arg0: i32) -> (i32, i32) {
    %c0_i32 = arith.constant 0 : i32
    %c0_i32_0 = arith.constant 0 : i32
    return %c0_i32, %arg0 : i32, i32
  }
  func.func @transform_1(%arg0: i32) -> (i32, i32, i32) {
    %c0_i32 = arith.constant 0 : i32
    %c0_i32_0 = arith.constant 0 : i32
    %c0_i32_1 = arith.constant 0 : i32
    %c0_i32_2 = arith.constant 0 : i32
    return %c0_i32, %c0_i32_0, %c0_i32_1 : i32, i32, i32
  }
  func.func @transform_2(%arg0: i32) -> (i32, i32, i32) {
    %c0_i32 = arith.constant 0 : i32
    %c0_i32_0 = arith.constant 0 : i32
    %c0_i32_1 = arith.constant 0 : i32
    %c0_i32_2 = arith.constant 0 : i32
    return %c0_i32, %c0_i32_0, %c0_i32_1 : i32, i32, i32
  }
  func.func @transform_3(%arg0: i32) -> (i32, i32) {
    %c0_i32 = arith.constant 0 : i32
    %c0_i32_0 = arith.constant 0 : i32
    return %c0_i32, %arg0 : i32, i32
  }
}

</mosaic_0001>

<bundles_post_ra>
// kernel: tpu_custom_call.1
= control target key start
LH: loop header
LB: loop body
LE: loop exit
PB: predicated region body
PF: predicated region fallthrough
CT: control target
= control target key end

     0   :  { %8 = vsyncpa [#allocation3], 0  ;;  %s2434_s0 = inlined_call_operand.hbm [shape: f32[64,128], index: 0, kind: input, shape index: {}]   ;;  %s2435_s1 = inlined_call_operand.vmem [shape: f32[5,128,128], index: 1, kind: input, shape index: {}]   ;;  %s2436_s2 = inlined_call_operand.vmem [shape: f32[5,128,1], index: 2, kind: input, shape index: {}]   ;;  %s2437_s3 = inlined_call_operand.hbm [shape: f32[1,128], index: 3, kind: output, shape index: {}]  }
   0x1   :  { %9 = vsyncpa [#allocation4], 0  ;;  %s1968_s12 = smov [#allocation2]   ;;  %s1920_s16 = scalar_lea.hbm %s2434_s0, 1024 }
   0x2   :  { %s15_s13 = sshll.u32 %s1968_s12, 4  ;;  %p1921_p0 = scmp.ne.s32.totalorder %s2434_s0, %s1920_s16  ;;  %s16_s13 = int_to_ptr.vmem [resolvable:$true] %s15_s13 }
   0x3   :  { %p1924_p1 = scmp.lt.u32.totalorder %s1920_s16, %s2434_s0 }
   0x5   :  { %p1926_p2 = pnand %p1924_p1, %p1921_p0 }
   0x7   :  { %1929 = shalt.err (!%p1926_p2)
}
   0x8   :  { %s1930_s21 = scalar_lea.vmem %s16_s13, 1024  ;;  %p1935_p4 = scmp.lt.s32.totalorder %s16_s13, %s16_s13 }
   0x9   :  { %p1931_p3 = scmp.ne.s32.totalorder %s16_s13, %s1930_s21  ;;  %p1936_p5 = scmp.lt.s32.totalorder %s1930_s21, %s1930_s21 }
   0xb   :  { %p1937_p6 = por %p1936_p5, %p1935_p4 }
   0xd   :  { %p1938_p7 = pnand %p1937_p6, %p1931_p3 }
   0xf   :  { %1941 = shalt.err (!%p1938_p7)
}
  0x10   :  { %s1969_s22 = smov 128   ;;  %s1970_s23 = smov 8  }
  0x11   :  { %21 = dma.hbm_to_vmem [thread:$0]  %s2434_s0, 1024, %s16_s13, [#allocation3], %s1969_s22, %s1969_s22, %s1970_s23  }
  0x12   :  { %1964 = dma.done.wait [#allocation3], 1024  }
  0x13   :  { %1965 = vsyncadd [#allocation3], 4294966272  ;;  %v1971_v0 = vmov 0   ;;  %v55_v1 = vld [vmem:[%s2436_s2 + $0x10] sm:$0xff]  ;;  %v53_v2 = vld [vmem:[%s2436_s2] sm:$0xff]  ;;  %vm149_vm0 = vcmask 523264  }
  0x14   :  { %1919 = vset.pattern.permute.xlu1 %v1971_v0  ;;  %1918 = vset.pattern.permute.xlu0 %v1971_v0  ;;  %v29_v3 = vld [vmem:[#allocation2] sm:$0xff]  ;;  %v30_v4 = vld [vmem:[#allocation2 + $0x8] sm:$0xff]  ;;  %v56_v6 = vld [vmem:[%s2436_s2 + $0x18] sm:$0xff]  ;;  %vm1973_vm1 = vmmov 0   ;;  %s1975_s30 = smov [#allocation5]  }
  0x15   :  { %81 = vperm.xlu1 %1919, %v55_v1   ;;  %71 = vperm.xlu0 %1918, %v53_v2   ;;  %v1774_v5 = vpack.c.bf16 %v30_v4, %v29_v3  ;;  %v31_v7 = vld [vmem:[#allocation2 + $0x10] sm:$0xff]  ;;  %v32_v8 = vld [vmem:[#allocation2 + $0x18] sm:$0xff]  ;;  %v54_v9 = vld [vmem:[%s2436_s2 + $0x8] sm:$0xff]  ;;  %s1271_s0 = sshll.u32 %s1975_s30, 4  ;;  %s1272_s0 = int_to_ptr.vmem [resolvable:$true] %s1271_s0 }
  0x16   :  { %v1778_v10 = vpack.c.bf16 %v32_v8, %v31_v7  ;;  %v33_v11 = vld [vmem:[#allocation2 + $0x20] sm:$0xff]  ;;  %v34_v12 = vld [vmem:[#allocation2 + $0x28] sm:$0xff]  ;;  %v35_v17 = vld [vmem:[#allocation2 + $0x30] sm:$0xff]  ;;  %s1942_s4 = scalar_lea.vmem %s1272_s0, 16  ;;  %s1946_s5 = scalar_lea.vmem %s1272_s0, 32 }
  0x17   :  { %1775 = vmatprep.subr.bf16.mxu0 %v1774_v5  ;;  %v58_v13 = vld [vmem:[%s2436_s2 + $0x28] sm:$0xff]  ;;  %v1782_v14 = vpack.c.bf16 %v34_v12, %v33_v11  ;;  %v37_v15 = vld [vmem:[%s2435_s1] sm:$0xff]  ;;  %v36_v18 = vld [vmem:[#allocation2 + $0x38] sm:$0xff]  ;;  %p1943_p8 = scmp.ne.s32.totalorder %s1272_s0, %s1942_s4  ;;  %p1947_p9 = scmp.lt.s32.totalorder %s1272_s0, %s1272_s0 }
  0x18   :  { %1777 = vmatpush3.bf16.msra.mxu0 %v1774_v5  ;;  %v57_v16 = vld [vmem:[%s2436_s2 + $0x20] sm:$0xff]  ;;  %1547 = vmatprep.mubr.msk.f32.mxu0 %vm149_vm0, %v37_v15  ;;  %v60_v19 = vld [vmem:[%s2436_s2 + $0x38] sm:$0xff]  ;;  %v1786_v20 = vpack.c.bf16 %v36_v18, %v35_v17  ;;  %v59_v21 = vld [vmem:[%s2436_s2 + $0x30] sm:$0xff]  ;;  %p1948_p10 = scmp.lt.s32.totalorder %s1946_s5, %s1942_s4 }
  0x19   :  { %86 = vperm.xlu1 %1919, %v56_v6   ;;  %76 = vperm.xlu0 %1918, %v54_v9   ;;  %v62_v22 = vld [vmem:[%s2436_s2 + $0x48] sm:$0xff]  ;;  %v61_v23 = vld [vmem:[%s2436_s2 + $0x40] sm:$0xff]  ;;  %v64_v25 = vld [vmem:[%s2436_s2 + $0x58] sm:$0xff] }
  0x1a   :  { %1779 = vmatprep.subr.bf16.mxu0 %v1778_v10  ;;  %v38_v24 = vld [vmem:[%s2435_s1 + $0x8] sm:$0xff]  ;;  %v39_v26 = vld [vmem:[%s2435_s1 + $0x10] sm:$0xff]  ;;  %v40_v28 = vld [vmem:[%s2435_s1 + $0x18] sm:$0xff]  ;;  %p1949_p11 = por %p1948_p10, %p1947_p9 }
  0x1b   :  { %v63_v27 = vld [vmem:[%s2436_s2 + $0x50] sm:$0xff]  ;;  %v66_v29 = vld [vmem:[%s2436_s2 + $0x68] sm:$0xff]  ;;  %v41_v30 = vld [vmem:[%s2435_s1 + $0x20] sm:$0xff] }
  0x1c   :  { %1781 = vmatpush3.bf16.msra.mxu0 %v1778_v10  ;;  %v65_v31 = vld [vmem:[%s2436_s2 + $0x60] sm:$0xff]  ;;  %v42_v32 = vld [vmem:[%s2435_s1 + $0x28] sm:$0xff]  ;;  %v68_v33 = vld [vmem:[%s2436_s2 + $0x78] sm:$0xff]  ;;  %p1950_p12 = pnand %p1949_p11, %p1943_p8 }
  0x1d   :  { %96 = vperm.xlu1 %1919, %v58_v13   ;;  %91 = vperm.xlu0 %1918, %v57_v16   ;;  %v43_v34 = vld [vmem:[%s2435_s1 + $0x30] sm:$0xff]  ;;  %v44_v36 = vld [vmem:[%s2435_s1 + $0x38] sm:$0xff]  ;;  %v1313_v37 = vld [vmem:[%s2436_s2 + $0x88] sm:$0xff] }
  0x1e   :  { %1783 = vmatprep.subr.bf16.mxu0 %v1782_v14  ;;  %v67_v35 = vld [vmem:[%s2436_s2 + $0x70] sm:$0xff]  ;;  %v45_v38 = vld [vmem:[%s2435_s1 + $0x40] sm:$0xff]  ;;  %v46_v40 = vld [vmem:[%s2435_s1 + $0x48] sm:$0xff] }
  0x1f   :  { %v1312_v39 = vld [vmem:[%s2436_s2 + $0x80] sm:$0xff]  ;;  %v1315_v41 = vld [vmem:[%s2436_s2 + $0x98] sm:$0xff]  ;;  %v47_v42 = vld [vmem:[%s2435_s1 + $0x50] sm:$0xff] }
  0x20   :  { %1785 = vmatpush3.bf16.msra.mxu0 %v1782_v14  ;;  %v1314_v43 = vld [vmem:[%s2436_s2 + $0x90] sm:$0xff]  ;;  %v48_v44 = vld [vmem:[%s2435_s1 + $0x58] sm:$0xff]  ;;  %v1317_v45 = vld [vmem:[%s2436_s2 + $0xa8] sm:$0xff] }
  0x21   :  { %106 = vperm.xlu1 %1919, %v60_v19   ;;  %101 = vperm.xlu0 %1918, %v59_v21   ;;  %v49_v46 = vld [vmem:[%s2435_s1 + $0x60] sm:$0xff]  ;;  %v50_v48 = vld [vmem:[%s2435_s1 + $0x68] sm:$0xff]  ;;  %v1319_v49 = vld [vmem:[%s2436_s2 + $0xb8] sm:$0xff] }
  0x22   :  { %1787 = vmatprep.subr.bf16.mxu0 %v1786_v20  ;;  %v1316_v47 = vld [vmem:[%s2436_s2 + $0xa0] sm:$0xff]  ;;  %v51_v50 = vld [vmem:[%s2435_s1 + $0x70] sm:$0xff]  ;;  %v52_v52 = vld [vmem:[%s2435_s1 + $0x78] sm:$0xff] }
  0x23   :  { %v1318_v51 = vld [vmem:[%s2436_s2 + $0xb0] sm:$0xff]  ;;  %v1321_v53 = vld [vmem:[%s2436_s2 + $0xc8] sm:$0xff]  ;;  %v1320_v54 = vld [vmem:[%s2436_s2 + $0xc0] sm:$0xff] }
  0x24   :  { %1789 = vmatpush3.bf16.msra.mxu0 %v1786_v20  ;;  %v1323_v55 = vld [vmem:[%s2436_s2 + $0xd8] sm:$0xff]  ;;  %v1322_v56 = vld [vmem:[%s2436_s2 + $0xd0] sm:$0xff]  ;;  %v1325_v57 = vld [vmem:[%s2436_s2 + $0xe8] sm:$0xff] }
  0x25   :  { %116 = vperm.xlu1 %1919, %v62_v22   ;;  %111 = vperm.xlu0 %1918, %v61_v23   ;;  %v1324_v58 = vld [vmem:[%s2436_s2 + $0xe0] sm:$0xff]  ;;  %v1327_v59 = vld [vmem:[%s2436_s2 + $0xf8] sm:$0xff]  ;;  %v1326_v60 = vld [vmem:[%s2436_s2 + $0xf0] sm:$0xff] }
  0x26   :  { %v1345_v61 = vld [vmem:[%s2436_s2 + $0x108] sm:$0xff]  ;;  %v1344_v62 = vld [vmem:[%s2436_s2 + $0x100] sm:$0xff]  ;;  %v1347_v63 = vld [vmem:[%s2436_s2 + $0x118] sm:$0xff] }
  0x27   :  { %1548 = vmatmul.mubr.msk.f32.vlgmr.msra.gmra.mrb[0].mxu0 %vm149_vm0, %v38_v24  ;;  %v1346_v0 = vld [vmem:[%s2436_s2 + $0x110] sm:$0xff]  ;;  %v1349_v1 = vld [vmem:[%s2436_s2 + $0x128] sm:$0xff]  ;;  %v1348_v2 = vld [vmem:[%s2436_s2 + $0x120] sm:$0xff] }
  0x28   :  { %1550 = vmatprep.mubr.msk.f32.mxu0 %vm149_vm0, %v39_v26  ;;  %v1351_v3 = vld [vmem:[%s2436_s2 + $0x138] sm:$0xff]  ;;  %v1350_v4 = vld [vmem:[%s2436_s2 + $0x130] sm:$0xff]  ;;  %v1353_v5 = vld [vmem:[%s2436_s2 + $0x148] sm:$0xff] }
  0x29   :  { %126 = vperm.xlu1 %1919, %v64_v25   ;;  %121 = vperm.xlu0 %1918, %v63_v27   ;;  %v1352_v6 = vld [vmem:[%s2436_s2 + $0x140] sm:$0xff]  ;;  %v1355_v7 = vld [vmem:[%s2436_s2 + $0x158] sm:$0xff]  ;;  %v1354_v8 = vld [vmem:[%s2436_s2 + $0x150] sm:$0xff] }
  0x2a   :  { %v1357_v9 = vld [vmem:[%s2436_s2 + $0x168] sm:$0xff]  ;;  %v1356_v10 = vld [vmem:[%s2436_s2 + $0x160] sm:$0xff]  ;;  %v1359_v11 = vld [vmem:[%s2436_s2 + $0x178] sm:$0xff] }
  0x2b   :  { %1551 = vmatmul.mubr.msk.f32.gmra.mrb[2].mxu0 %vm149_vm0, %v40_v28  ;;  %v1358_v12 = vld [vmem:[%s2436_s2 + $0x170] sm:$0xff]  ;;  %v1377_v13 = vld [vmem:[%s2436_s2 + $0x188] sm:$0xff]  ;;  %v1376_v14 = vld [vmem:[%s2436_s2 + $0x180] sm:$0xff] }
  0x2c   :  { %1553 = vmatprep.mubr.msk.f32.mxu0 %vm149_vm0, %v41_v30  ;;  %v1379_v15 = vld [vmem:[%s2436_s2 + $0x198] sm:$0xff]  ;;  %v1378_v16 = vld [vmem:[%s2436_s2 + $0x190] sm:$0xff]  ;;  %v1381_v17 = vld [vmem:[%s2436_s2 + $0x1a8] sm:$0xff] }
  0x2d   :  { %136 = vperm.xlu1 %1919, %v66_v29   ;;  %131 = vperm.xlu0 %1918, %v65_v31   ;;  %v1380_v18 = vld [vmem:[%s2436_s2 + $0x1a0] sm:$0xff]  ;;  %v1383_v19 = vld [vmem:[%s2436_s2 + $0x1b8] sm:$0xff]  ;;  %v1382_v20 = vld [vmem:[%s2436_s2 + $0x1b0] sm:$0xff] }
  0x2e   :  { %v1385_v21 = vld [vmem:[%s2436_s2 + $0x1c8] sm:$0xff]  ;;  %v1384_v22 = vld [vmem:[%s2436_s2 + $0x1c0] sm:$0xff]  ;;  %v1387_v23 = vld [vmem:[%s2436_s2 + $0x1d8] sm:$0xff] }
  0x2f   :  { %1554 = vmatmul.mubr.msk.f32.gmra.mrb[4].mxu0 %vm149_vm0, %v42_v32  ;;  %v1386_v24 = vld [vmem:[%s2436_s2 + $0x1d0] sm:$0xff]  ;;  %v1389_v25 = vld [vmem:[%s2436_s2 + $0x1e8] sm:$0xff]  ;;  %v1388_v26 = vld [vmem:[%s2436_s2 + $0x1e0] sm:$0xff] }
  0x30   :  { %1556 = vmatprep.mubr.msk.f32.mxu0 %vm149_vm0, %v43_v34  ;;  %v1391_v27 = vld [vmem:[%s2436_s2 + $0x1f8] sm:$0xff]  ;;  %v1390_v28 = vld [vmem:[%s2436_s2 + $0x1f0] sm:$0xff]  ;;  %v1393_v29 = vld [vmem:[%s2436_s2 + $0x200] sm:$0x1] }
  0x31   :  { %146 = vperm.xlu1 %1919, %v68_v33   ;;  %141 = vperm.xlu0 %1918, %v67_v35   ;;  %v1296_v30 = vld [vmem:[%s2435_s1 + $0x80] sm:$0xff] }
  0x32   :  { %1603 = vmatprep.mubr.f32.mxu1 %v1296_v30 }
  0x33   :  { %1557 = vmatmul.mubr.msk.f32.gmra.mrb[6].mxu0 %vm149_vm0, %v44_v36 }
  0x34   :  { %1559 = vmatprep.mubr.msk.f32.mxu0 %vm149_vm0, %v45_v38 }
  0x35   :  { %400 = vperm.xlu1 %1919, %v1313_v37   ;;  %395 = vperm.xlu0 %1918, %v1312_v39  }
  0x37   :  { %1560 = vmatmul.mubr.msk.f32.gmra.mrb[8].mxu0 %vm149_vm0, %v46_v40 }
  0x38   :  { %1562 = vmatprep.mubr.msk.f32.mxu0 %vm149_vm0, %v47_v42 }
  0x39   :  { %410 = vperm.xlu1 %1919, %v1315_v41   ;;  %405 = vperm.xlu0 %1918, %v1314_v43  }
  0x3b   :  { %1563 = vmatmul.mubr.msk.f32.gmra.mrb[10].mxu0 %vm149_vm0, %v48_v44 }
  0x3c   :  { %1565 = vmatprep.mubr.msk.f32.mxu0 %vm149_vm0, %v49_v46 }
  0x3d   :  { %420 = vperm.xlu1 %1919, %v1317_v45   ;;  %415 = vperm.xlu0 %1918, %v1316_v47  }
  0x3f   :  { %1566 = vmatmul.mubr.msk.f32.gmra.mrb[12].mxu0 %vm149_vm0, %v50_v48 }
  0x40   :  { %1568 = vmatprep.mubr.msk.f32.mxu0 %vm149_vm0, %v51_v50 }
  0x41   :  { %430 = vperm.xlu1 %1919, %v1319_v49   ;;  %425 = vperm.xlu0 %1918, %v1318_v51  }
  0x43   :  { %1569 = vmatmul.mubr.msk.f32.gmra.mrb[14].mxu0 %vm149_vm0, %v52_v52 }
  0x45   :  { %440 = vperm.xlu1 %1919, %v1321_v53   ;;  %435 = vperm.xlu0 %1918, %v1320_v54  }
  0x49   :  { %450 = vperm.xlu1 %1919, %v1323_v55   ;;  %445 = vperm.xlu0 %1918, %v1322_v56  }
  0x4d   :  { %460 = vperm.xlu1 %1919, %v1325_v57   ;;  %455 = vperm.xlu0 %1918, %v1324_v58  }
  0x51   :  { %470 = vperm.xlu1 %1919, %v1327_v59   ;;  %465 = vperm.xlu0 %1918, %v1326_v60  }
  0x55   :  { %675 = vperm.xlu1 %1919, %v1345_v61   ;;  %670 = vperm.xlu0 %1918, %v1344_v62  }
  0x59   :  { %685 = vperm.xlu1 %1919, %v1347_v63   ;;  %680 = vperm.xlu0 %1918, %v1346_v0  }
  0x5d   :  { %695 = vperm.xlu1 %1919, %v1349_v1   ;;  %690 = vperm.xlu0 %1918, %v1348_v2  }
  0x61   :  { %705 = vperm.xlu1 %1919, %v1351_v3   ;;  %700 = vperm.xlu0 %1918, %v1350_v4  }
  0x65   :  { %715 = vperm.xlu1 %1919, %v1353_v5   ;;  %710 = vperm.xlu0 %1918, %v1352_v6  }
  0x69   :  { %725 = vperm.xlu1 %1919, %v1355_v7   ;;  %720 = vperm.xlu0 %1918, %v1354_v8  }
  0x6d   :  { %735 = vperm.xlu1 %1919, %v1357_v9   ;;  %730 = vperm.xlu0 %1918, %v1356_v10  }
  0x71   :  { %745 = vperm.xlu1 %1919, %v1359_v11   ;;  %740 = vperm.xlu0 %1918, %v1358_v12  }
  0x75   :  { %950 = vperm.xlu1 %1919, %v1377_v13   ;;  %945 = vperm.xlu0 %1918, %v1376_v14  }
  0x79   :  { %960 = vperm.xlu1 %1919, %v1379_v15   ;;  %955 = vperm.xlu0 %1918, %v1378_v16  }
  0x7d   :  { %970 = vperm.xlu1 %1919, %v1381_v17   ;;  %965 = vperm.xlu0 %1918, %v1380_v18  }
  0x81   :  { %980 = vperm.xlu1 %1919, %v1383_v19   ;;  %975 = vperm.xlu0 %1918, %v1382_v20  }
  0x85   :  { %990 = vperm.xlu1 %1919, %v1385_v21   ;;  %985 = vperm.xlu0 %1918, %v1384_v22  }
  0x89   :  { %1000 = vperm.xlu1 %1919, %v1387_v23   ;;  %995 = vperm.xlu0 %1918, %v1386_v24  }
  0x8d   :  { %1010 = vperm.xlu1 %1919, %v1389_v25   ;;  %1005 = vperm.xlu0 %1918, %v1388_v26  }
  0x91   :  { %1020 = vperm.xlu1 %1919, %v1391_v27   ;;  %1015 = vperm.xlu0 %1918, %v1390_v28  }
  0x94   :  { %v82_v31 = vpop.permute.xlu1 %81  ;;  %v72_v32 = vpop.permute.xlu0 %71 }
  0x95   :  { %1190 = vperm.xlu0 %1918, %v1393_v29  }
  0x98   :  { %v87_v33 = vpop.permute.xlu1 %86  ;;  %v77_v34 = vpop.permute.xlu0 %76 }
  0x9c   :  { %v97_v35 = vpop.permute.xlu1 %96  ;;  %v92_v36 = vpop.permute.xlu0 %91 }
  0xa0   :  { %v107_v42 = vpop.permute.xlu1 %106  ;;  %v102_v45 = vpop.permute.xlu0 %101 }
  0xa4   :  { %v117_v55 = vpop.permute.xlu1 %116  ;;  %v112_v58 = vpop.permute.xlu0 %111 }
  0xa8   :  { %v127_v3 = vpop.permute.xlu1 %126  ;;  %v122_v6 = vpop.permute.xlu0 %121 }
  0xac   :  { %v137_v16 = vpop.permute.xlu1 %136  ;;  %v132_v19 = vpop.permute.xlu0 %131 }
  0xb0   :  { %v147_v28 = vpop.permute.xlu1 %146 }
  0xfa   :  { %v1549_v37 = vpop.f32.mrb[0].mxu0 }
  0xfb   :  { %v270_v38 = vadd.f32 %v1549_v37, %v77_v34  ;;  %v264_v39 = vpop.f32.mrb[1].mxu0 }
  0xfc   :  { %v265_v40 = vadd.f32 %v264_v39, %v72_v32  ;;  %v1297_v39 = vld [vmem:[%s2435_s1 + $0x88] sm:$0xff] }
  0xfd   :  { %v344_v41 = vmax.f32 %v270_v38, 0.0 }
  0xfe   :  { %v343_v43 = vmax.f32 %v265_v40, 0.0  ;;  %v1552_v44 = vpop.f32.mrb[2].mxu0  ;;  %v1298_v40 = vld [vmem:[%s2435_s1 + $0x90] sm:$0xff] }
  0xff   :  { %v280_v46 = vadd.f32 %v1552_v44, %v87_v33  ;;  %v274_v47 = vpop.f32.mrb[3].mxu0  ;;  %v1302_v44 = vld [vmem:[%s2435_s1 + $0xb0] sm:$0xff] }
 0x100   :  { %v275_v48 = vadd.f32 %v274_v47, %v82_v31  ;;  %v1790_v49 = vpack.c.bf16 %v344_v41, %v343_v43  ;;  %v142_v31 = vpop.permute.xlu0 %141  ;;  %v1299_v41 = vld [vmem:[%s2435_s1 + $0x98] sm:$0xff]  ;;  %v1301_v43 = vld [vmem:[%s2435_s1 + $0xa8] sm:$0xff] }
 0x101   :  { %v346_v50 = vmax.f32 %v280_v46, 0.0  ;;  %v1304_v46 = vld [vmem:[%s2435_s1 + $0xc0] sm:$0xff]  ;;  %v1305_v47 = vld [vmem:[%s2435_s1 + $0xc8] sm:$0xff] }
 0x102   :  { %v345_v51 = vmax.f32 %v275_v48, 0.0  ;;  %v1555_v52 = vpop.f32.mrb[4].mxu0  ;;  %1791 = vmatprep.subr.bf16.mxu1 %v1790_v49  ;;  %v1306_v48 = vld [vmem:[%s2435_s1 + $0xd0] sm:$0xff] }
 0x103   :  { %v290_v53 = vadd.f32 %v1555_v52, %v97_v35  ;;  %v284_v54 = vpop.f32.mrb[5].mxu0  ;;  %1793 = vmatpush3.bf16.msra.mxu1 %v1790_v49  ;;  %v1307_v49 = vld [vmem:[%s2435_s1 + $0xd8] sm:$0xff]  ;;  %v1310_v52 = vld [vmem:[%s2435_s1 + $0xf0] sm:$0xff] }
 0x104   :  { %v1794_v56 = vpack.c.bf16 %v346_v50, %v345_v51  ;;  %v285_v57 = vadd.f32 %v284_v54, %v92_v36  ;;  %v1308_v50 = vld [vmem:[%s2435_s1 + $0xe0] sm:$0xff]  ;;  %v1309_v51 = vld [vmem:[%s2435_s1 + $0xe8] sm:$0xff] }
 0x105   :  { %v348_v59 = vmax.f32 %v290_v53, 0.0  ;;  %v1311_v53 = vld [vmem:[%s2435_s1 + $0xf8] sm:$0xff]  ;;  %v1328_v54 = vld [vmem:[%s2435_s1 + $0x100] sm:$0xff] }
 0x106   :  { %v347_v60 = vmax.f32 %v285_v57, 0.0  ;;  %v1558_v61 = vpop.f32.mrb[6].mxu0  ;;  %1795 = vmatprep.subr.bf16.mxu1 %v1794_v56  ;;  %1659 = vmatprep.mubr.f32.mxu0 %v1328_v54 }
 0x107   :  { %v300_v62 = vadd.f32 %v1558_v61, %v107_v42  ;;  %v294_v63 = vpop.f32.mrb[7].mxu0  ;;  %1797 = vmatpush3.bf16.msra.mxu1 %v1794_v56  ;;  %v1300_v42 = vld [vmem:[%s2435_s1 + $0xa0] sm:$0xff]  ;;  %v396_v56 = vpop.permute.xlu0 %395 }
 0x108   :  { %v1798_v0 = vpack.c.bf16 %v348_v59, %v347_v60  ;;  %v295_v1 = vadd.f32 %v294_v63, %v102_v45  ;;  %v1303_v45 = vld [vmem:[%s2435_s1 + $0xb8] sm:$0xff] }
 0x109   :  { %v350_v2 = vmax.f32 %v300_v62, 0.0 }
 0x10a   :  { %v349_v4 = vmax.f32 %v295_v1, 0.0  ;;  %v1561_v5 = vpop.f32.mrb[8].mxu0  ;;  %1799 = vmatprep.subr.bf16.mxu1 %v1798_v0 }
 0x10b   :  { %v310_v7 = vadd.f32 %v1561_v5, %v117_v55  ;;  %v304_v8 = vpop.f32.mrb[9].mxu0  ;;  %1801 = vmatpush3.bf16.msra.mxu1 %v1798_v0  ;;  %v401_v55 = vpop.permute.xlu1 %400 }
 0x10c   :  { %v1802_v9 = vpack.c.bf16 %v350_v2, %v349_v4  ;;  %v305_v10 = vadd.f32 %v304_v8, %v112_v58  ;;  %v406_v58 = vpop.permute.xlu0 %405 }
 0x10d   :  { %v352_v11 = vmax.f32 %v310_v7, 0.0 }
 0x10e   :  { %v351_v12 = vmax.f32 %v305_v10, 0.0  ;;  %v1564_v13 = vpop.f32.mrb[10].mxu0  ;;  %1803 = vmatprep.subr.bf16.mxu1 %v1802_v9 }
 0x10f   :  { %v320_v14 = vadd.f32 %v1564_v13, %v127_v3  ;;  %v314_v15 = vpop.f32.mrb[11].mxu0  ;;  %1805 = vmatpush3.bf16.msra.mxu1 %v1802_v9  ;;  %v411_v57 = vpop.permute.xlu1 %410 }
 0x110   :  { %v1806_v17 = vpack.c.bf16 %v352_v11, %v351_v12  ;;  %v315_v18 = vadd.f32 %v314_v15, %v122_v6  ;;  %v416_v60 = vpop.permute.xlu0 %415 }
 0x111   :  { %v354_v20 = vmax.f32 %v320_v14, 0.0 }
 0x112   :  { %v353_v21 = vmax.f32 %v315_v18, 0.0  ;;  %v1567_v22 = vpop.f32.mrb[12].mxu0  ;;  %1807 = vmatprep.subr.bf16.mxu1 %v1806_v17 }
 0x113   :  { %v330_v23 = vadd.f32 %v1567_v22, %v137_v16  ;;  %v324_v24 = vpop.f32.mrb[13].mxu0  ;;  %1809 = vmatpush3.bf16.msra.mxu1 %v1806_v17  ;;  %v421_v59 = vpop.permute.xlu1 %420 }
 0x114   :  { %v1810_v25 = vpack.c.bf16 %v354_v20, %v353_v21  ;;  %v325_v26 = vadd.f32 %v324_v24, %v132_v19  ;;  %v426_v5 = vpop.permute.xlu0 %425 }
 0x115   :  { %v356_v27 = vmax.f32 %v330_v23, 0.0 }
 0x116   :  { %v355_v29 = vmax.f32 %v325_v26, 0.0  ;;  %v1570_v30 = vpop.f32.mrb[14].mxu0  ;;  %1811 = vmatprep.subr.bf16.mxu1 %v1810_v25 }
 0x117   :  { %v340_v32 = vadd.f32 %v1570_v30, %v147_v28  ;;  %v334_v33 = vpop.f32.mrb[15].mxu0  ;;  %1813 = vmatpush3.bf16.msra.mxu1 %v1810_v25  ;;  %v431_v2 = vpop.permute.xlu1 %430 }
 0x118   :  { %v1814_v34 = vpack.c.bf16 %v356_v27, %v355_v29  ;;  %v335_v35 = vadd.f32 %v334_v33, %v142_v31  ;;  %v436_v18 = vpop.permute.xlu0 %435 }
 0x119   :  { %v358_v36 = vmax.f32 %v340_v32, 0.0 }
 0x11a   :  { %v357_v37 = vmax.f32 %v335_v35, 0.0  ;;  %1815 = vmatprep.subr.bf16.mxu1 %v1814_v34 }
 0x11b   :  { %1817 = vmatpush3.bf16.msra.mxu1 %v1814_v34  ;;  %v441_v15 = vpop.permute.xlu1 %440 }
 0x11c   :  { %v1818_v38 = vpack.c.bf16 %v358_v36, %v357_v37  ;;  %v446_v30 = vpop.permute.xlu0 %445 }
 0x11e   :  { %1819 = vmatprep.subr.bf16.mxu1 %v1818_v38 }
 0x11f   :  { %1821 = vmatpush3.bf16.msra.mxu1 %v1818_v38  ;;  %v451_v27 = vpop.permute.xlu1 %450 }
 0x122   :  { %1604 = vmatmul.mubr.f32.vlgmr.msra.gmra.mrb[0].mxu1 %v1297_v39 }
 0x123   :  { %1606 = vmatprep.mubr.f32.mxu1 %v1298_v40  ;;  %v461_v40 = vpop.permute.xlu1 %460 }
 0x126   :  { %1607 = vmatmul.mubr.f32.gmra.mrb[2].mxu1 %v1299_v41 }
 0x127   :  { %1609 = vmatprep.mubr.f32.mxu1 %v1300_v42 }
 0x12a   :  { %1610 = vmatmul.mubr.f32.gmra.mrb[4].mxu1 %v1301_v43  ;;  %v456_v43 = vpop.permute.xlu0 %455 }
 0x12b   :  { %1612 = vmatprep.mubr.f32.mxu1 %v1302_v44 }
 0x12e   :  { %1613 = vmatmul.mubr.f32.gmra.mrb[6].mxu1 %v1303_v45 }
 0x12f   :  { %1615 = vmatprep.mubr.f32.mxu1 %v1304_v46 }
 0x132   :  { %1616 = vmatmul.mubr.f32.gmra.mrb[8].mxu1 %v1305_v47 }
 0x133   :  { %1618 = vmatprep.mubr.f32.mxu1 %v1306_v48 }
 0x136   :  { %1619 = vmatmul.mubr.f32.gmra.mrb[10].mxu1 %v1307_v49 }
 0x137   :  { %1621 = vmatprep.mubr.f32.mxu1 %v1308_v50 }
 0x13a   :  { %1622 = vmatmul.mubr.f32.gmra.mrb[12].mxu1 %v1309_v51 }
 0x13b   :  { %1624 = vmatprep.mubr.f32.mxu1 %v1310_v52  ;;  %v471_v52 = vpop.permute.xlu1 %470 }
 0x13e   :  { %1625 = vmatmul.mubr.f32.gmra.mrb[14].mxu1 %v1311_v53 }
 0x1f5   :  { %v1605_v61 = vpop.f32.mrb[0].mxu1 }
 0x1f6   :  { %v545_v62 = vadd.f32 %v1605_v61, %v401_v55  ;;  %v539_v63 = vpop.f32.mrb[1].mxu1  ;;  %v466_v55 = vpop.permute.xlu0 %465 }
 0x1f7   :  { %v540_v0 = vadd.f32 %v539_v63, %v396_v56  ;;  %v1329_v63 = vld [vmem:[%s2435_s1 + $0x108] sm:$0xff] }
 0x1f8   :  { %v619_v1 = vmax.f32 %v545_v62, 0.0 }
 0x1f9   :  { %v618_v3 = vmax.f32 %v540_v0, 0.0  ;;  %v1608_v4 = vpop.f32.mrb[2].mxu1  ;;  %v1330_v0 = vld [vmem:[%s2435_s1 + $0x110] sm:$0xff] }
 0x1fa   :  { %v555_v6 = vadd.f32 %v1608_v4, %v411_v57  ;;  %v549_v7 = vpop.f32.mrb[3].mxu1  ;;  %v1334_v4 = vld [vmem:[%s2435_s1 + $0x130] sm:$0xff] }
 0x1fb   :  { %v1822_v8 = vpack.c.bf16 %v619_v1, %v618_v3  ;;  %v550_v9 = vadd.f32 %v549_v7, %v406_v58  ;;  %v1331_v1 = vld [vmem:[%s2435_s1 + $0x118] sm:$0xff]  ;;  %v1333_v3 = vld [vmem:[%s2435_s1 + $0x128] sm:$0xff] }
 0x1fc   :  { %v621_v10 = vmax.f32 %v555_v6, 0.0  ;;  %v1336_v6 = vld [vmem:[%s2435_s1 + $0x140] sm:$0xff]  ;;  %v1337_v7 = vld [vmem:[%s2435_s1 + $0x148] sm:$0xff] }
 0x1fd   :  { %v620_v11 = vmax.f32 %v550_v9, 0.0  ;;  %v1611_v12 = vpop.f32.mrb[4].mxu1  ;;  %1823 = vmatprep.subr.bf16.mxu0 %v1822_v8  ;;  %v1339_v9 = vld [vmem:[%s2435_s1 + $0x158] sm:$0xff] }
 0x1fe   :  { %v565_v13 = vadd.f32 %v1611_v12, %v421_v59  ;;  %v559_v14 = vpop.f32.mrb[5].mxu1  ;;  %1825 = vmatpush3.bf16.msra.mxu0 %v1822_v8  ;;  %v1338_v8 = vld [vmem:[%s2435_s1 + $0x150] sm:$0xff] }
 0x1ff   :  { %v1826_v16 = vpack.c.bf16 %v621_v10, %v620_v11  ;;  %v560_v17 = vadd.f32 %v559_v14, %v416_v60  ;;  %v1340_v10 = vld [vmem:[%s2435_s1 + $0x160] sm:$0xff]  ;;  %v1341_v11 = vld [vmem:[%s2435_s1 + $0x168] sm:$0xff]  ;;  %v1342_v12 = vld [vmem:[%s2435_s1 + $0x170] sm:$0xff] }
 0x200   :  { %v623_v19 = vmax.f32 %v565_v13, 0.0  ;;  %v1343_v13 = vld [vmem:[%s2435_s1 + $0x178] sm:$0xff]  ;;  %v1360_v14 = vld [vmem:[%s2435_s1 + $0x180] sm:$0xff] }
 0x201   :  { %v622_v20 = vmax.f32 %v560_v17, 0.0  ;;  %v1614_v21 = vpop.f32.mrb[6].mxu1  ;;  %1827 = vmatprep.subr.bf16.mxu0 %v1826_v16  ;;  %1715 = vmatprep.mubr.f32.mxu1 %v1360_v14 }
 0x202   :  { %v575_v22 = vadd.f32 %v1614_v21, %v431_v2  ;;  %v569_v23 = vpop.f32.mrb[7].mxu1  ;;  %1829 = vmatpush3.bf16.msra.mxu0 %v1826_v16  ;;  %v1332_v2 = vld [vmem:[%s2435_s1 + $0x120] sm:$0xff]  ;;  %v671_v16 = vpop.permute.xlu0 %670 }
 0x203   :  { %v1830_v24 = vpack.c.bf16 %v623_v19, %v622_v20  ;;  %v570_v25 = vadd.f32 %v569_v23, %v426_v5  ;;  %v1335_v5 = vld [vmem:[%s2435_s1 + $0x138] sm:$0xff] }
 0x204   :  { %v625_v26 = vmax.f32 %v575_v22, 0.0 }
 0x205   :  { %v624_v28 = vmax.f32 %v570_v25, 0.0  ;;  %v1617_v29 = vpop.f32.mrb[8].mxu1  ;;  %1831 = vmatprep.subr.bf16.mxu0 %v1830_v24 }
 0x206   :  { %v585_v31 = vadd.f32 %v1617_v29, %v441_v15  ;;  %v579_v32 = vpop.f32.mrb[9].mxu1  ;;  %1833 = vmatpush3.bf16.msra.mxu0 %v1830_v24  ;;  %v676_v15 = vpop.permute.xlu1 %675 }
 0x207   :  { %v1834_v33 = vpack.c.bf16 %v625_v26, %v624_v28  ;;  %v580_v34 = vadd.f32 %v579_v32, %v436_v18  ;;  %v681_v18 = vpop.permute.xlu0 %680 }
 0x208   :  { %v627_v35 = vmax.f32 %v585_v31, 0.0 }
 0x209   :  { %v626_v36 = vmax.f32 %v580_v34, 0.0  ;;  %v1620_v37 = vpop.f32.mrb[10].mxu1  ;;  %1835 = vmatprep.subr.bf16.mxu0 %v1834_v33 }
 0x20a   :  { %v595_v38 = vadd.f32 %v1620_v37, %v451_v27  ;;  %v589_v39 = vpop.f32.mrb[11].mxu1  ;;  %1837 = vmatpush3.bf16.msra.mxu0 %v1834_v33  ;;  %v686_v17 = vpop.permute.xlu1 %685 }
 0x20b   :  { %v1838_v41 = vpack.c.bf16 %v627_v35, %v626_v36  ;;  %v590_v42 = vadd.f32 %v589_v39, %v446_v30  ;;  %v691_v20 = vpop.permute.xlu0 %690 }
 0x20c   :  { %v629_v44 = vmax.f32 %v595_v38, 0.0 }
 0x20d   :  { %v628_v45 = vmax.f32 %v590_v42, 0.0  ;;  %v1623_v46 = vpop.f32.mrb[12].mxu1  ;;  %1839 = vmatprep.subr.bf16.mxu0 %v1838_v41 }
 0x20e   :  { %v605_v47 = vadd.f32 %v1623_v46, %v461_v40  ;;  %v599_v48 = vpop.f32.mrb[13].mxu1  ;;  %1841 = vmatpush3.bf16.msra.mxu0 %v1838_v41  ;;  %v696_v19 = vpop.permute.xlu1 %695 }
 0x20f   :  { %v1842_v49 = vpack.c.bf16 %v629_v44, %v628_v45  ;;  %v600_v50 = vadd.f32 %v599_v48, %v456_v43  ;;  %v701_v29 = vpop.permute.xlu0 %700 }
 0x210   :  { %v631_v51 = vmax.f32 %v605_v47, 0.0 }
 0x211   :  { %v630_v53 = vmax.f32 %v600_v50, 0.0  ;;  %v1626_v54 = vpop.f32.mrb[14].mxu1  ;;  %1843 = vmatprep.subr.bf16.mxu0 %v1842_v49 }
 0x212   :  { %v615_v56 = vadd.f32 %v1626_v54, %v471_v52  ;;  %v609_v57 = vpop.f32.mrb[15].mxu1  ;;  %1845 = vmatpush3.bf16.msra.mxu0 %v1842_v49  ;;  %v706_v26 = vpop.permute.xlu1 %705 }
 0x213   :  { %v1846_v58 = vpack.c.bf16 %v631_v51, %v630_v53  ;;  %v610_v59 = vadd.f32 %v609_v57, %v466_v55  ;;  %v711_v42 = vpop.permute.xlu0 %710 }
 0x214   :  { %v633_v60 = vmax.f32 %v615_v56, 0.0 }
 0x215   :  { %v632_v61 = vmax.f32 %v610_v59, 0.0  ;;  %1847 = vmatprep.subr.bf16.mxu0 %v1846_v58 }
 0x216   :  { %1849 = vmatpush3.bf16.msra.mxu0 %v1846_v58  ;;  %v716_v39 = vpop.permute.xlu1 %715 }
 0x217   :  { %v1850_v62 = vpack.c.bf16 %v633_v60, %v632_v61  ;;  %v721_v54 = vpop.permute.xlu0 %720 }
 0x219   :  { %1851 = vmatprep.subr.bf16.mxu0 %v1850_v62 }
 0x21a   :  { %1853 = vmatpush3.bf16.msra.mxu0 %v1850_v62  ;;  %v726_v51 = vpop.permute.xlu1 %725 }
 0x21d   :  { %1660 = vmatmul.mubr.f32.vlgmr.msra.gmra.mrb[16].mxu0 %v1329_v63 }
 0x21e   :  { %1662 = vmatprep.mubr.f32.mxu0 %v1330_v0  ;;  %v736_v0 = vpop.permute.xlu1 %735 }
 0x221   :  { %1663 = vmatmul.mubr.f32.gmra.mrb[18].mxu0 %v1331_v1 }
 0x222   :  { %1665 = vmatprep.mubr.f32.mxu0 %v1332_v2 }
 0x225   :  { %1666 = vmatmul.mubr.f32.gmra.mrb[20].mxu0 %v1333_v3  ;;  %v731_v3 = vpop.permute.xlu0 %730 }
 0x226   :  { %1668 = vmatprep.mubr.f32.mxu0 %v1334_v4 }
 0x229   :  { %1669 = vmatmul.mubr.f32.gmra.mrb[22].mxu0 %v1335_v5 }
 0x22a   :  { %1671 = vmatprep.mubr.f32.mxu0 %v1336_v6 }
 0x22d   :  { %1672 = vmatmul.mubr.f32.gmra.mrb[24].mxu0 %v1337_v7 }
 0x22e   :  { %1674 = vmatprep.mubr.f32.mxu0 %v1338_v8 }
 0x231   :  { %1675 = vmatmul.mubr.f32.gmra.mrb[26].mxu0 %v1339_v9 }
 0x232   :  { %1677 = vmatprep.mubr.f32.mxu0 %v1340_v10 }
 0x235   :  { %1678 = vmatmul.mubr.f32.gmra.mrb[28].mxu0 %v1341_v11 }
 0x236   :  { %1680 = vmatprep.mubr.f32.mxu0 %v1342_v12  ;;  %v746_v12 = vpop.permute.xlu1 %745 }
 0x239   :  { %1681 = vmatmul.mubr.f32.gmra.mrb[30].mxu0 %v1343_v13 }
 0x2f0   :  { %v1661_v21 = vpop.f32.mrb[16].mxu0 }
 0x2f1   :  { %v820_v22 = vadd.f32 %v1661_v21, %v676_v15  ;;  %v814_v23 = vpop.f32.mrb[17].mxu0  ;;  %v741_v15 = vpop.permute.xlu0 %740 }
 0x2f2   :  { %v815_v24 = vadd.f32 %v814_v23, %v671_v16  ;;  %v1361_v23 = vld [vmem:[%s2435_s1 + $0x188] sm:$0xff] }
 0x2f3   :  { %v894_v25 = vmax.f32 %v820_v22, 0.0 }
 0x2f4   :  { %v893_v27 = vmax.f32 %v815_v24, 0.0  ;;  %v1664_v28 = vpop.f32.mrb[18].mxu0  ;;  %v1362_v24 = vld [vmem:[%s2435_s1 + $0x190] sm:$0xff] }
 0x2f5   :  { %v830_v30 = vadd.f32 %v1664_v28, %v686_v17  ;;  %v824_v31 = vpop.f32.mrb[19].mxu0  ;;  %v1366_v28 = vld [vmem:[%s2435_s1 + $0x1b0] sm:$0xff] }
 0x2f6   :  { %v1854_v32 = vpack.c.bf16 %v894_v25, %v893_v27  ;;  %v825_v33 = vadd.f32 %v824_v31, %v681_v18  ;;  %v1363_v25 = vld [vmem:[%s2435_s1 + $0x198] sm:$0xff]  ;;  %v1365_v27 = vld [vmem:[%s2435_s1 + $0x1a8] sm:$0xff] }
 0x2f7   :  { %v896_v34 = vmax.f32 %v830_v30, 0.0  ;;  %v1368_v30 = vld [vmem:[%s2435_s1 + $0x1c0] sm:$0xff]  ;;  %v1369_v31 = vld [vmem:[%s2435_s1 + $0x1c8] sm:$0xff] }
 0x2f8   :  { %v895_v35 = vmax.f32 %v825_v33, 0.0  ;;  %v1667_v36 = vpop.f32.mrb[20].mxu0  ;;  %1855 = vmatprep.subr.bf16.mxu1 %v1854_v32  ;;  %v1371_v33 = vld [vmem:[%s2435_s1 + $0x1d8] sm:$0xff] }
 0x2f9   :  { %v840_v37 = vadd.f32 %v1667_v36, %v696_v19  ;;  %v834_v38 = vpop.f32.mrb[21].mxu0  ;;  %1857 = vmatpush3.bf16.msra.mxu1 %v1854_v32  ;;  %v1370_v32 = vld [vmem:[%s2435_s1 + $0x1d0] sm:$0xff] }
 0x2fa   :  { %v1858_v40 = vpack.c.bf16 %v896_v34, %v895_v35  ;;  %v835_v41 = vadd.f32 %v834_v38, %v691_v20  ;;  %v1372_v34 = vld [vmem:[%s2435_s1 + $0x1e0] sm:$0xff]  ;;  %v1373_v35 = vld [vmem:[%s2435_s1 + $0x1e8] sm:$0xff]  ;;  %v1374_v36 = vld [vmem:[%s2435_s1 + $0x1f0] sm:$0xff]  ;;  %v1972_v38 = vmov 0.0|0.0  }
 0x2fb   :  { %v898_v43 = vmax.f32 %v840_v37, 0.0  ;;  %v1375_v37 = vld [vmem:[%s2435_s1 + $0x1f8] sm:$0xff]  ;;  %1886 = vmatprep.subr.bf16.mxu0 %v1972_v38 }
 0x2fc   :  { %v897_v44 = vmax.f32 %v835_v41, 0.0  ;;  %v1670_v45 = vpop.f32.mrb[22].mxu0  ;;  %1859 = vmatprep.subr.bf16.mxu1 %v1858_v40  ;;  %v946_v41 = vpop.permute.xlu0 %945 }
 0x2fd   :  { %v850_v46 = vadd.f32 %v1670_v45, %v706_v26  ;;  %v844_v47 = vpop.f32.mrb[23].mxu0  ;;  %1861 = vmatpush3.bf16.msra.mxu1 %v1858_v40  ;;  %v1364_v26 = vld [vmem:[%s2435_s1 + $0x1a0] sm:$0xff]  ;;  %v951_v40 = vpop.permute.xlu1 %950 }
 0x2fe   :  { %v1862_v48 = vpack.c.bf16 %v898_v43, %v897_v44  ;;  %v845_v49 = vadd.f32 %v844_v47, %v701_v29  ;;  %v1367_v29 = vld [vmem:[%s2435_s1 + $0x1b8] sm:$0xff] }
 0x2ff   :  { %v900_v50 = vmax.f32 %v850_v46, 0.0 }
 0x300   :  { %v899_v52 = vmax.f32 %v845_v49, 0.0  ;;  %v1673_v53 = vpop.f32.mrb[24].mxu0  ;;  %1863 = vmatprep.subr.bf16.mxu1 %v1862_v48  ;;  %v956_v43 = vpop.permute.xlu0 %955 }
 0x301   :  { %v860_v55 = vadd.f32 %v1673_v53, %v716_v39  ;;  %v854_v56 = vpop.f32.mrb[25].mxu0  ;;  %1865 = vmatpush3.bf16.msra.mxu1 %v1862_v48  ;;  %v1974_v39 = vmov 0.0  }
 0x302   :  { %v1866_v57 = vpack.c.bf16 %v900_v50, %v899_v52  ;;  %v855_v58 = vadd.f32 %v854_v56, %v711_v42  ;;  %1771 = vmatprep.mubr.msk.f32.mxu0 %vm1973_vm1, %v1974_v39  ;;  %v961_v42 = vpop.permute.xlu1 %960 }
 0x303   :  { %v902_v59 = vmax.f32 %v860_v55, 0.0 }
 0x304   :  { %v901_v60 = vmax.f32 %v855_v58, 0.0  ;;  %v1676_v61 = vpop.f32.mrb[26].mxu0  ;;  %1867 = vmatprep.subr.bf16.mxu1 %v1866_v57  ;;  %v966_v45 = vpop.permute.xlu0 %965 }
 0x305   :  { %v870_v62 = vadd.f32 %v1676_v61, %v726_v51  ;;  %v864_v63 = vpop.f32.mrb[27].mxu0  ;;  %1869 = vmatpush3.bf16.msra.mxu1 %v1866_v57 }
 0x306   :  { %v1870_v1 = vpack.c.bf16 %v902_v59, %v901_v60  ;;  %v865_v2 = vadd.f32 %v864_v63, %v721_v54  ;;  %v971_v44 = vpop.permute.xlu1 %970 }
 0x307   :  { %v904_v4 = vmax.f32 %v870_v62, 0.0 }
 0x308   :  { %v903_v5 = vmax.f32 %v865_v2, 0.0  ;;  %v1679_v6 = vpop.f32.mrb[28].mxu0  ;;  %1871 = vmatprep.subr.bf16.mxu1 %v1870_v1  ;;  %v976_v54 = vpop.permute.xlu0 %975 }
 0x309   :  { %v880_v7 = vadd.f32 %v1679_v6, %v736_v0  ;;  %v874_v8 = vpop.f32.mrb[29].mxu0  ;;  %1873 = vmatpush3.bf16.msra.mxu1 %v1870_v1 }
 0x30a   :  { %v1874_v9 = vpack.c.bf16 %v904_v4, %v903_v5  ;;  %v875_v10 = vadd.f32 %v874_v8, %v731_v3  ;;  %v981_v51 = vpop.permute.xlu1 %980 }
 0x30b   :  { %v906_v11 = vmax.f32 %v880_v7, 0.0 }
 0x30c   :  { %v905_v13 = vmax.f32 %v875_v10, 0.0  ;;  %v1682_v14 = vpop.f32.mrb[30].mxu0  ;;  %1875 = vmatprep.subr.bf16.mxu1 %v1874_v9  ;;  %v986_v3 = vpop.permute.xlu0 %985 }
 0x30d   :  { %v890_v16 = vadd.f32 %v1682_v14, %v746_v12  ;;  %v884_v17 = vpop.f32.mrb[31].mxu0  ;;  %1877 = vmatpush3.bf16.msra.mxu1 %v1874_v9 }
 0x30e   :  { %v1878_v18 = vpack.c.bf16 %v906_v11, %v905_v13  ;;  %v885_v19 = vadd.f32 %v884_v17, %v741_v15  ;;  %v991_v0 = vpop.permute.xlu1 %990 }
 0x30f   :  { %v908_v20 = vmax.f32 %v890_v16, 0.0 }
 0x310   :  { %v907_v21 = vmax.f32 %v885_v19, 0.0  ;;  %1879 = vmatprep.subr.bf16.mxu1 %v1878_v18  ;;  %v996_v15 = vpop.permute.xlu0 %995 }
 0x311   :  { %1881 = vmatpush3.bf16.msra.mxu1 %v1878_v18 }
 0x312   :  { %v1882_v22 = vpack.c.bf16 %v908_v20, %v907_v21  ;;  %v1001_v12 = vpop.permute.xlu1 %1000 }
 0x314   :  { %1883 = vmatprep.subr.bf16.mxu1 %v1882_v22 }
 0x315   :  { %1885 = vmatpush3.bf16.msra.mxu1 %v1882_v22 }
 0x318   :  { %1716 = vmatmul.mubr.f32.vlgmr.msra.gmra.mrb[16].mxu1 %v1361_v23 }
 0x319   :  { %1718 = vmatprep.mubr.f32.mxu1 %v1362_v24 }
 0x31c   :  { %1719 = vmatmul.mubr.f32.gmra.mrb[18].mxu1 %v1363_v25  ;;  %v1011_v25 = vpop.permute.xlu1 %1010 }
 0x31d   :  { %1721 = vmatprep.mubr.f32.mxu1 %v1364_v26 }
 0x320   :  { %1722 = vmatmul.mubr.f32.gmra.mrb[20].mxu1 %v1365_v27 }
 0x321   :  { %1724 = vmatprep.mubr.f32.mxu1 %v1366_v28  ;;  %v1006_v28 = vpop.permute.xlu0 %1005 }
 0x324   :  { %1725 = vmatmul.mubr.f32.gmra.mrb[22].mxu1 %v1367_v29 }
 0x325   :  { %1727 = vmatprep.mubr.f32.mxu1 %v1368_v30 }
 0x328   :  { %1728 = vmatmul.mubr.f32.gmra.mrb[24].mxu1 %v1369_v31 }
 0x329   :  { %1730 = vmatprep.mubr.f32.mxu1 %v1370_v32 }
 0x32c   :  { %1731 = vmatmul.mubr.f32.gmra.mrb[26].mxu1 %v1371_v33 }
 0x32d   :  { %1733 = vmatprep.mubr.f32.mxu1 %v1372_v34 }
 0x330   :  { %1734 = vmatmul.mubr.f32.gmra.mrb[28].mxu1 %v1373_v35 }
 0x331   :  { %1736 = vmatprep.mubr.f32.mxu1 %v1374_v36 }
 0x334   :  { %1737 = vmatmul.mubr.f32.gmra.mrb[30].mxu1 %v1375_v37  ;;  %v1021_v37 = vpop.permute.xlu1 %1020 }
 0x3eb   :  { %v1717_v46 = vpop.f32.mrb[16].mxu1 }
 0x3ec   :  { %v1095_v47 = vadd.f32 %v1717_v46, %v951_v40  ;;  %v1089_v48 = vpop.f32.mrb[17].mxu1 }
 0x3ed   :  { %v1090_v49 = vadd.f32 %v1089_v48, %v946_v41  ;;  %v1016_v41 = vpop.permute.xlu0 %1015 }
 0x3ee   :  { %v1169_v50 = vmax.f32 %v1095_v47, 0.0 }
 0x3ef   :  { %v1168_v52 = vmax.f32 %v1090_v49, 0.0  ;;  %v1720_v53 = vpop.f32.mrb[18].mxu1  ;;  %v1392_v49 = vld [vmem:[%s2435_s1 + $0x200] sm:$0x1] }
 0x3f0   :  { %v1105_v55 = vadd.f32 %v1720_v53, %v961_v42  ;;  %v1099_v56 = vpop.f32.mrb[19].mxu1 }
 0x3f1   :  { %v1887_v57 = vpack.c.bf16 %v1169_v50, %v1168_v52  ;;  %v1100_v58 = vadd.f32 %v1099_v56, %v956_v43  ;;  %v1191_v50 = vpop.permute.xlu0 %1190 }
 0x3f2   :  { %v1171_v59 = vmax.f32 %v1105_v55, 0.0 }
 0x3f3   :  { %v1170_v60 = vmax.f32 %v1100_v58, 0.0  ;;  %v1723_v61 = vpop.f32.mrb[20].mxu1  ;;  %1888 = vmatpush3.bf16.msra.mxu0 %v1887_v57 }
 0x3f4   :  { %v1115_v62 = vadd.f32 %v1723_v61, %v971_v44  ;;  %v1109_v63 = vpop.f32.mrb[21].mxu1  ;;  %1889 = vmatprep.subr.bf16.mxu0 %v1972_v38 }
 0x3f5   :  { %v1890_v1 = vpack.c.bf16 %v1171_v59, %v1170_v60  ;;  %v1110_v2 = vadd.f32 %v1109_v63, %v966_v45 }
 0x3f6   :  { %v1173_v4 = vmax.f32 %v1115_v62, 0.0 }
 0x3f7   :  { %v1172_v5 = vmax.f32 %v1110_v2, 0.0  ;;  %v1726_v6 = vpop.f32.mrb[22].mxu1  ;;  %1891 = vmatpush3.bf16.msra.mxu0 %v1890_v1 }
 0x3f8   :  { %v1125_v7 = vadd.f32 %v1726_v6, %v981_v51  ;;  %v1119_v8 = vpop.f32.mrb[23].mxu1  ;;  %1892 = vmatprep.subr.bf16.mxu0 %v1972_v38 }
 0x3f9   :  { %v1893_v9 = vpack.c.bf16 %v1173_v4, %v1172_v5  ;;  %v1120_v10 = vadd.f32 %v1119_v8, %v976_v54 }
 0x3fa   :  { %v1175_v11 = vmax.f32 %v1125_v7, 0.0 }
 0x3fb   :  { %v1174_v13 = vmax.f32 %v1120_v10, 0.0  ;;  %v1729_v14 = vpop.f32.mrb[24].mxu1  ;;  %1894 = vmatpush3.bf16.msra.mxu0 %v1893_v9 }
 0x3fc   :  { %v1135_v16 = vadd.f32 %v1729_v14, %v991_v0  ;;  %v1129_v17 = vpop.f32.mrb[25].mxu1  ;;  %1895 = vmatprep.subr.bf16.mxu0 %v1972_v38 }
 0x3fd   :  { %v1896_v18 = vpack.c.bf16 %v1175_v11, %v1174_v13  ;;  %v1130_v19 = vadd.f32 %v1129_v17, %v986_v3 }
 0x3fe   :  { %v1177_v20 = vmax.f32 %v1135_v16, 0.0 }
 0x3ff   :  { %v1176_v21 = vmax.f32 %v1130_v19, 0.0  ;;  %v1732_v22 = vpop.f32.mrb[26].mxu1  ;;  %1897 = vmatpush3.bf16.msra.mxu0 %v1896_v18 }
 0x400   :  { %v1145_v23 = vadd.f32 %v1732_v22, %v1001_v12  ;;  %v1139_v24 = vpop.f32.mrb[27].mxu1  ;;  %1898 = vmatprep.subr.bf16.mxu0 %v1972_v38 }
 0x401   :  { %v1899_v26 = vpack.c.bf16 %v1177_v20, %v1176_v21  ;;  %v1140_v27 = vadd.f32 %v1139_v24, %v996_v15 }
 0x402   :  { %v1179_v29 = vmax.f32 %v1145_v23, 0.0 }
 0x403   :  { %v1178_v30 = vmax.f32 %v1140_v27, 0.0  ;;  %v1735_v31 = vpop.f32.mrb[28].mxu1  ;;  %1900 = vmatpush3.bf16.msra.mxu0 %v1899_v26 }
 0x404   :  { %v1155_v32 = vadd.f32 %v1735_v31, %v1011_v25  ;;  %v1149_v33 = vpop.f32.mrb[29].mxu1  ;;  %1901 = vmatprep.subr.bf16.mxu0 %v1972_v38 }
 0x405   :  { %v1902_v34 = vpack.c.bf16 %v1179_v29, %v1178_v30  ;;  %v1150_v35 = vadd.f32 %v1149_v33, %v1006_v28 }
 0x406   :  { %v1181_v36 = vmax.f32 %v1155_v32, 0.0 }
 0x407   :  { %v1180_v39 = vmax.f32 %v1150_v35, 0.0  ;;  %v1738_v40 = vpop.f32.mrb[30].mxu1  ;;  %1903 = vmatpush3.bf16.msra.mxu0 %v1902_v34 }
 0x408   :  { %v1165_v42 = vadd.f32 %v1738_v40, %v1021_v37  ;;  %v1159_v43 = vpop.f32.mrb[31].mxu1  ;;  %1904 = vmatprep.subr.bf16.mxu0 %v1972_v38 }
 0x409   :  { %v1905_v44 = vpack.c.bf16 %v1181_v36, %v1180_v39  ;;  %v1160_v45 = vadd.f32 %v1159_v43, %v1016_v41 }
 0x40a   :  { %v1183_v46 = vmax.f32 %v1165_v42, 0.0 }
 0x40b   :  { %v1182_v47 = vmax.f32 %v1160_v45, 0.0  ;;  %1906 = vmatpush3.bf16.msra.mxu0 %v1905_v44 }
 0x40c   :  { %1907 = vmatprep.subr.bf16.mxu0 %v1972_v38 }
 0x40d   :  { %v1908_v48 = vpack.c.bf16 %v1183_v46, %v1182_v47 }
 0x40f   :  { %1909 = vmatpush3.bf16.msra.mxu0 %v1908_v48 }
 0x412   :  { %1772 = vmatmul.mubr.f32.vlgmr.msra.gmra.mrb[32].mxu0 %v1392_v49 }
 0x4e5   :  { %v1259_v51 = vpop.f32.mrb[32].mxu0 }
 0x4e6   :  { %v1260_v52 = vadd.f32 %v1259_v51, %v1191_v50  ;;  %v1773_v53 = vpop.f32.mrb[33].mxu0 }
 0x4e8   :  { %v1263_v54 = vmax.f32 %v1260_v52, 0.0 }
 0x4ea   :  { %1264 = vst [vmem:[#allocation5] sm:$0x1] %v1263_v54 }
 0x4eb   :  { %1953 = shalt.err (!%p1950_p12)
}
 0x4ec   :  { %s1954_s7 = scalar_lea.hbm %s2437_s3, 16 }
 0x4ed   :  { %p1955_p13 = scmp.ne.s32.totalorder %s2437_s3, %s1954_s7  ;;  %p1958_p0 = scmp.lt.u32.totalorder %s1954_s7, %s2437_s3 }
 0x4ef   :  { %p1960_p1 = pnand %p1958_p0, %p1955_p13 }
 0x4f1   :  { %1963 = shalt.err (!%p1960_p1)
}
 0x4f2   :  { %1274 = dma.vmem_to_hbm [thread:$0]  %s1272_s0, 16, %s2437_s3, [#allocation4]  }
 0x4f3   :  { %1966 = dma.done.wait [#allocation4], 16  }
 0x4f4   :  { %1967 = vsyncadd [#allocation4], 4294967280 }
 0x4f5   :  { %1278 = vsyncpa [#allocation3], 1 }
 0x4f6   :  { %1279 = vsyncpa [#allocation4], 1 }

</bundles_post_ra>
